<compile_context>
chip_gen: v7x
topology: tpu7x:2x2x1
jax: 0.10.0
libtpu: 0.0.40
codegen_flags: <defaults>
</compile_context>

<pallas_src>
import functools
import time

import jax
import jax.numpy as jnp
from jax.experimental import pallas as pl
from jax.experimental.pallas import tpu as pltpu


def _layernorm_kernel(x_ref, w_ref, b_ref, o_ref, *, eps):
    """Row-tile layer norm: x_ref (bm, H), w_ref/b_ref (1, H), o_ref (bm, H)."""
    x = x_ref[...].astype(jnp.float32)                       # (bm, H)
    mean = jnp.mean(x, axis=-1, keepdims=True)               # XLU reduce
    xc = x - mean
    var = jnp.mean(xc * xc, axis=-1, keepdims=True)
    inv = jax.lax.rsqrt(var + eps)                           # EUP
    y = xc * inv
    w = w_ref[...].astype(jnp.float32)                       # (1, H) broadcast
    b = b_ref[...].astype(jnp.float32)
    o_ref[...] = (y * w + b).astype(o_ref.dtype)


def _round_up(x, m):
    return ((x + m - 1) // m) * m


def layernorm_pallas(x2d, weight, bias, *, eps=1e-5, bm=256):
    """x2d: (M, H); weight/bias: (H,). LayerNorm over the last dim."""
    M, H = x2d.shape
    # sublane packing: 8 rows/vreg for 32-bit, 16 for 16-bit dtypes
    row_align = 8 * max(1, 4 // jnp.dtype(x2d.dtype).itemsize)
    bm = max(row_align, min(bm, _round_up(M, row_align)))
    bm = _round_up(bm, row_align)

    Mp = _round_up(M, bm)
    if Mp != M:
        # single pad only for the ragged last tile; padded rows are sliced off
        x2d = jnp.pad(x2d, ((0, Mp - M), (0, 0)))

    w2 = weight.reshape(1, H)
    b2 = bias.reshape(1, H)

    out = pl.pallas_call(
        functools.partial(_layernorm_kernel, eps=eps),
        out_shape=jax.ShapeDtypeStruct((Mp, H), x2d.dtype),
        grid=(pl.cdiv(Mp, bm),),
        in_specs=[
            pl.BlockSpec((bm, H), lambda i: (i, 0)),
            pl.BlockSpec((1, H), lambda i: (0, 0)),
            pl.BlockSpec((1, H), lambda i: (0, 0)),
        ],
        out_specs=pl.BlockSpec((bm, H), lambda i: (i, 0)),
        compiler_params=pltpu.CompilerParams(
            dimension_semantics=("parallel",)),
    )(x2d, w2, b2)

    return out[:M] if Mp != M else out


def megatron_layernorm_forward(hidden_states, lay_weight, bias, *,
                               tp=1, enable_sequence_parallel=False, eps=1e-5):
    """MegatronLayernorm.forward (without the timing tuple)."""
    if enable_sequence_parallel:
        s = hidden_states.shape[0] // tp
        hidden_states = hidden_states[:s]                    # torch.chunk(...)[0]
    S, B, H = hidden_states.shape
    out2d = layernorm_pallas(hidden_states.reshape(S * B, H), lay_weight, bias,
                             eps=eps)
    out = out2d.reshape(S, B, H)
    if enable_sequence_parallel:
        out = jnp.tile(out, (tp, 1, 1))                      # .repeat((tp, 1, 1))
    return out


def _reference(hidden_states, lay_weight, bias, tp, enable_sequence_parallel,
               eps=1e-5):
    """Pure-JAX reference of the module's forward."""
    if enable_sequence_parallel:
        s = hidden_states.shape[0] // tp
        hidden_states = hidden_states[:s]
    x = hidden_states.astype(jnp.float32)
    mean = x.mean(-1, keepdims=True)
    var = ((x - mean) ** 2).mean(-1, keepdims=True)
    y = (x - mean) * jax.lax.rsqrt(var + eps)
    out = (y * lay_weight.astype(jnp.float32) + bias.astype(jnp.float32))
    out = out.astype(hidden_states.dtype)
    if enable_sequence_parallel:
        out = jnp.tile(out, (tp, 1, 1))
    return out


if __name__ == "__main__":
    key = jax.random.PRNGKey(0)
    k1, k2 = jax.random.split(key)

    # Module-consistent small shapes: hidden_states is (seq, batch, hidden).
    seq, batch, hidden = 16, 2, 256     # hidden multiple of 128 -> lane-dense stores
    tp = 2
    enable_sequence_parallel = True

    hidden_states = jax.random.normal(k1, (seq, batch, hidden), jnp.float32)
    lay_weight = jax.random.uniform(k2, (hidden,), jnp.float32)   # torch.rand init
    bias = jnp.zeros((hidden,), jnp.float32)                      # torch.zeros init

    # float32 path
    t0 = time.perf_counter()
    out = megatron_layernorm_forward(
        hidden_states, lay_weight, bias,
        tp=tp, enable_sequence_parallel=enable_sequence_parallel)
    out = jax.block_until_ready(out)
    lay_time_ms = (time.perf_counter() - t0) * 1e3
    # TODO(synk): cuda_timing_decorator (CUDA events) has no Pallas equivalent;
    # lay_time_ms above is the host-side analog returned alongside the output.

    ref = _reference(hidden_states, lay_weight, bias, tp,
                     enable_sequence_parallel)
    assert out.shape == hidden_states.shape
    assert jnp.allclose(out, ref, rtol=2e-3, atol=2e-3), "f32 mismatch vs reference"

    # bfloat16 path (Megatron's usual args.dtype); f32 compute inside the kernel
    hs_bf = hidden_states.astype(jnp.bfloat16)
    w_bf = lay_weight.astype(jnp.bfloat16)
    b_bf = bias.astype(jnp.bfloat16)
    out_bf = jax.block_until_ready(
        megatron_layernorm_forward(hs_bf, w_bf, b_bf, tp=tp,
                                   enable_sequence_parallel=enable_sequence_parallel))
    ref_bf = _reference(hs_bf, w_bf, b_bf, tp, enable_sequence_parallel)
    assert jnp.allclose(out_bf.astype(jnp.float32), ref_bf.astype(jnp.float32),
                        rtol=2e-2, atol=2e-2), "bf16 mismatch vs reference"

    print("KERNEL_OK")
</pallas_src>

<mosaic_0001>
module attributes {stable_mosaic.version = 11 : i64} {
  func.func @_layernorm_kernel(%arg0: i32, %arg1: memref<16x256xf32, #tpu.memory_space<vmem>>, %arg2: memref<1x256xf32, #tpu.memory_space<vmem>>, %arg3: memref<1x256xf32, #tpu.memory_space<vmem>>, %arg4: memref<16x256xf32, #tpu.memory_space<vmem>>) attributes {dimension_semantics = [#tpu.dimension_semantics<parallel>], iteration_bounds = array<i64: 1>, scalar_prefetch = 0 : i64, scratch_operands = 0 : i64, tpu.core_type = #tpu.core_type<tc>, window_params = [{transform_indices = @transform_0, window_bounds = array<i64: 16, 256>}, {pipeline_mode = #tpu.pipeline_mode<synchronous>, transform_indices = @transform_1, window_bounds = array<i64: 1, 256>}, {pipeline_mode = #tpu.pipeline_mode<synchronous>, transform_indices = @transform_2, window_bounds = array<i64: 1, 256>}, {transform_indices = @transform_3, window_bounds = array<i64: 16, 256>}]} {
    %c0 = arith.constant 0 : index
    %c0_0 = arith.constant 0 : index
    %0 = vector.load %arg1[%c0, %c0_0] : memref<16x256xf32, #tpu.memory_space<vmem>>, vector<16x256xf32>
    %cst = arith.constant dense<0.000000e+00> : vector<16xf32>
    %1 = vector.multi_reduction <add>, %0, %cst [1] : vector<16x256xf32> to vector<16xf32>
    %2 = vector.shape_cast %1 : vector<16xf32> to vector<16x1xf32>
    %cst_1 = arith.constant 2.560000e+02 : f32
    %3 = vector.broadcast %cst_1 : f32 to vector<16x1xf32>
    %4 = arith.divf %2, %3 : vector<16x1xf32>
    %5 = vector.broadcast %4 : vector<16x1xf32> to vector<16x256xf32>
    %6 = arith.subf %0, %5 : vector<16x256xf32>
    %7 = arith.mulf %6, %6 : vector<16x256xf32>
    %cst_2 = arith.constant dense<0.000000e+00> : vector<16xf32>
    %8 = vector.multi_reduction <add>, %7, %cst_2 [1] : vector<16x256xf32> to vector<16xf32>
    %9 = vector.shape_cast %8 : vector<16xf32> to vector<16x1xf32>
    %cst_3 = arith.constant 2.560000e+02 : f32
    %10 = vector.broadcast %cst_3 : f32 to vector<16x1xf32>
    %11 = arith.divf %9, %10 : vector<16x1xf32>
    %cst_4 = arith.constant 9.99999974E-6 : f32
    %12 = vector.broadcast %cst_4 : f32 to vector<16x1xf32>
    %13 = arith.addf %11, %12 : vector<16x1xf32>
    %14 = math.rsqrt %13 : vector<16x1xf32>
    %15 = vector.broadcast %14 : vector<16x1xf32> to vector<16x256xf32>
    %16 = arith.mulf %6, %15 : vector<16x256xf32>
    %c0_5 = arith.constant 0 : index
    %c0_6 = arith.constant 0 : index
    %17 = vector.load %arg2[%c0_5, %c0_6] : memref<1x256xf32, #tpu.memory_space<vmem>>, vector<1x256xf32>
    %c0_7 = arith.constant 0 : index
    %c0_8 = arith.constant 0 : index
    %18 = vector.load %arg3[%c0_7, %c0_8] : memref<1x256xf32, #tpu.memory_space<vmem>>, vector<1x256xf32>
    %19 = vector.broadcast %17 : vector<1x256xf32> to vector<16x256xf32>
    %20 = arith.mulf %16, %19 : vector<16x256xf32>
    %21 = vector.broadcast %18 : vector<1x256xf32> to vector<16x256xf32>
    %22 = arith.addf %20, %21 : vector<16x256xf32>
    %c0_9 = arith.constant 0 : index
    %c0_10 = arith.constant 0 : index
    %23 = vector.load %arg4[%c0_9, %c0_10] : memref<16x256xf32, #tpu.memory_space<vmem>>, vector<16x256xf32>
    tpu.vector_store %arg4[%c0_9, %c0_10], %22 {strides = array<i32>} : memref<16x256xf32, #tpu.memory_space<vmem>>, vector<16x256xf32>,
    return
  }
  func.func @transform_0(%arg0: i32) -> (i32, i32) {
    %c0_i32 = arith.constant 0 : i32
    %c0_i32_0 = arith.constant 0 : i32
    return %arg0, %c0_i32 : i32, i32
  }
  func.func @transform_1(%arg0: i32) -> (i32, i32) {
    %c0_i32 = arith.constant 0 : i32
    %c0_i32_0 = arith.constant 0 : i32
    %c0_i32_1 = arith.constant 0 : i32
    return %c0_i32, %c0_i32_0 : i32, i32
  }
  func.func @transform_2(%arg0: i32) -> (i32, i32) {
    %c0_i32 = arith.constant 0 : i32
    %c0_i32_0 = arith.constant 0 : i32
    %c0_i32_1 = arith.constant 0 : i32
    return %c0_i32, %c0_i32_0 : i32, i32
  }
  func.func @transform_3(%arg0: i32) -> (i32, i32) {
    %c0_i32 = arith.constant 0 : i32
    %c0_i32_0 = arith.constant 0 : i32
    return %arg0, %c0_i32 : i32, i32
  }
}

</mosaic_0001>

<bundles_post_ra>
// kernel: tpu_custom_call.1
= control target key start
LH: loop header
LB: loop body
LE: loop exit
PB: predicated region body
PF: predicated region fallthrough
CT: control target
= control target key end

     0   :  { %8 = vsyncpa [#allocation3], 0  ;;  %s235_s0 = inlined_call_operand.hbm [shape: f32[16,256], index: 0, kind: input, shape index: {}]   ;;  %s236_s1 = inlined_call_operand.vmem [shape: f32[1,256], index: 1, kind: input, shape index: {}]   ;;  %s237_s2 = inlined_call_operand.vmem [shape: f32[1,256], index: 2, kind: input, shape index: {}]   ;;  %s238_s3 = inlined_call_operand.hbm [shape: f32[16,256], index: 3, kind: output, shape index: {}]  }
   0x1   :  { %9 = vsyncpa [#allocation4], 0  ;;  %s175_s12 = smov [#allocation2]   ;;  %s127_s16 = scalar_lea.hbm %s235_s0, 512 }
   0x2   :  { %s15_s13 = sshll.u32 %s175_s12, 4  ;;  %p128_p0 = scmp.ne.s32.totalorder %s235_s0, %s127_s16  ;;  %s16_s13 = int_to_ptr.vmem [resolvable:$true] %s15_s13 }
   0x3   :  { %p131_p1 = scmp.lt.u32.totalorder %s127_s16, %s235_s0 }
   0x5   :  { %p133_p2 = pnand %p131_p1, %p128_p0 }
   0x7   :  { %136 = shalt.err (!%p133_p2)
}
   0x8   :  { %s137_s21 = scalar_lea.vmem %s16_s13, 512  ;;  %p142_p4 = scmp.lt.s32.totalorder %s16_s13, %s16_s13 }
   0x9   :  { %p138_p3 = scmp.ne.s32.totalorder %s16_s13, %s137_s21  ;;  %p143_p5 = scmp.lt.s32.totalorder %s137_s21, %s137_s21 }
   0xb   :  { %p144_p6 = por %p143_p5, %p142_p4 }
   0xd   :  { %p145_p7 = pnand %p144_p6, %p138_p3 }
   0xf   :  { %148 = shalt.err (!%p145_p7)
}
  0x10   :  { %s176_s22 = smov 256   ;;  %s177_s23 = smov 16  }
  0x11   :  { %21 = dma.hbm_to_vmem [thread:$0]  %s235_s0, 512, %s16_s13, [#allocation3], %s176_s22, %s176_s22, %s177_s23  }
  0x12   :  { %171 = dma.done.wait [#allocation3], 512  }
  0x13   :  { %172 = vsyncadd [#allocation3], 4294966784  ;;  %v29_v0 = vld [vmem:[#allocation2] sm:$0xff]  ;;  %v30_v1 = vld [vmem:[#allocation2 + $0x8] sm:$0xff]  ;;  %v69_v22 = vlaneseq  ;;  %s178_s29 = smov [#allocation5]  }
  0x14   :  { %v31_v2 = vld [vmem:[#allocation2 + $0x10] sm:$0xff]  ;;  %v33_v3 = vadd.f32 %v30_v1, %v29_v0  ;;  %v32_v4 = vld [vmem:[#allocation2 + $0x18] sm:$0xff]  ;;  %v66_v30 = vld [vmem:[%s236_s1] sm:$0x3]  ;;  %s107_s1 = sshll.u32 %s178_s29, 4  ;;  %s108_s1 = int_to_ptr.vmem [resolvable:$true] %s107_s1 }
  0x15   :  { %v36_v5 = vadd.f32 %v32_v4, %v31_v2  ;;  %v70_v26 = vshrl.u32 %v69_v22, 7  ;;  %v67_v31 = vld [vmem:[%s237_s2] sm:$0x3]  ;;  %s149_s2 = scalar_lea.vmem %s108_s1, 512  ;;  %p154_p9 = scmp.lt.s32.totalorder %s108_s1, %s108_s1 }
  0x16   :  { %34 = vadd.xlane.f32.xlu0 %v33_v3  ;;  %p150_p8 = scmp.ne.s32.totalorder %s108_s1, %s149_s2  ;;  %p155_p10 = scmp.lt.s32.totalorder %s149_s2, %s149_s2 }
  0x17   :  { %v71_v28 = vsub.s32 0, %v70_v26  ;;  %v75_v29 = vsub.s32 1, %v70_v26 }
  0x18   :  { %p156_p11 = por %p155_p10, %p154_p9 }
  0x19   :  { %v72_v32 = vrot.slane %v66_v30, %v71_v28  ;;  %v76_v33 = vrot.slane %v66_v30, %v75_v29  ;;  %v87_v37 = vrot.slane %v67_v31, %v71_v28  ;;  %v91_v38 = vrot.slane %v67_v31, %v75_v29 }
  0x1a   :  { %37 = vadd.xlane.f32.xlu0 %v36_v5  ;;  %p157_p12 = pnand %p156_p11, %p150_p8 }
  0xa3   :  { %v35_v6 = vpop.xlane.xlu0 %34 }
  0xa4   :  { %v40_v7 = vmul.f32 0.00390625, %v35_v6 }
  0xa6   :  { %v42_v8 = vsub.f32 %v29_v0, %v40_v7  ;;  %v43_v9 = vsub.f32 %v30_v1, %v40_v7 }
  0xa7   :  { %v38_v10 = vpop.xlane.xlu0 %37 }
  0xa8   :  { %v41_v11 = vmul.f32 0.00390625, %v38_v10  ;;  %v46_v12 = vmul.f32 %v42_v8, %v42_v8  ;;  %v47_v13 = vmul.f32 %v43_v9, %v43_v9 }
  0xaa   :  { %v44_v14 = vsub.f32 %v31_v2, %v41_v11  ;;  %v45_v15 = vsub.f32 %v32_v4, %v41_v11  ;;  %v50_v16 = vadd.f32 %v47_v13, %v46_v12 }
  0xac   :  { %51 = vadd.xlane.f32.xlu1 %v50_v16  ;;  %v48_v17 = vmul.f32 %v44_v14, %v44_v14  ;;  %v49_v18 = vmul.f32 %v45_v15, %v45_v15 }
  0xae   :  { %v53_v19 = vadd.f32 %v49_v18, %v48_v17 }
  0xb0   :  { %54 = vadd.xlane.f32.xlu1 %v53_v19 }
 0x139   :  { %v52_v20 = vpop.xlane.xlu1 %51 }
 0x13a   :  { %v56_v21 = vmul.f32 0.00390625, %v52_v20 }
 0x13c   :  { %v58_v23 = vadd.f32 1e-05, %v56_v21 }
 0x13d   :  { %v55_v24 = vpop.xlane.xlu1 %54 }
 0x13e   :  { %123 = vrsqrt.f32 %v58_v23  ;;  %v57_v25 = vmul.f32 0.00390625, %v55_v24 }
 0x140   :  { %v59_v27 = vadd.f32 1e-05, %v57_v25 }
 0x142   :  { %125 = vrsqrt.f32 %v59_v27 }
 0x148   :  { %v124_v34 = vpop.eup %123 }
 0x149   :  { %v62_v35 = vmul.f32 %v124_v34, %v42_v8  ;;  %v63_v36 = vmul.f32 %v124_v34, %v43_v9 }
 0x14b   :  { %v79_v39 = vmul.f32 %v72_v32, %v62_v35  ;;  %v80_v40 = vmul.f32 %v76_v33, %v63_v36 }
 0x14c   :  { %v126_v41 = vpop.eup %125 }
 0x14d   :  { %v64_v42 = vmul.f32 %v126_v41, %v44_v14  ;;  %v65_v43 = vmul.f32 %v126_v41, %v45_v15  ;;  %v94_v44 = vadd.f32 %v87_v37, %v79_v39  ;;  %v95_v45 = vadd.f32 %v91_v38, %v80_v40 }
 0x14f   :  { %v81_v46 = vmul.f32 %v72_v32, %v64_v42  ;;  %v82_v47 = vmul.f32 %v76_v33, %v65_v43  ;;  %98 = vst [vmem:[#allocation5] sm:$0xff] %v94_v44  ;;  %99 = vst [vmem:[#allocation5 + $0x8] sm:$0xff] %v95_v45 }
 0x151   :  { %v96_v48 = vadd.f32 %v87_v37, %v81_v46  ;;  %v97_v49 = vadd.f32 %v91_v38, %v82_v47 }
 0x153   :  { %100 = vst [vmem:[#allocation5 + $0x10] sm:$0xff] %v96_v48  ;;  %101 = vst [vmem:[#allocation5 + $0x18] sm:$0xff] %v97_v49 }
 0x154   :  { %160 = shalt.err (!%p157_p12)
}
 0x155   :  { %s161_s5 = scalar_lea.hbm %s238_s3, 512 }
 0x156   :  { %p162_p13 = scmp.ne.s32.totalorder %s238_s3, %s161_s5  ;;  %p165_p0 = scmp.lt.u32.totalorder %s161_s5, %s238_s3 }
 0x158   :  { %p167_p1 = pnand %p165_p0, %p162_p13 }
 0x15a   :  { %170 = shalt.err (!%p167_p1)
}
 0x15b   :  { %113 = dma.vmem_to_hbm [thread:$0]  %s108_s1, 512, %s238_s3, [#allocation4], %s176_s22, %s176_s22, %s177_s23  }
 0x15c   :  { %173 = dma.done.wait [#allocation4], 512  }
 0x15d   :  { %174 = vsyncadd [#allocation4], 4294966784 }
 0x15e   :  { %117 = vsyncpa [#allocation3], 1 }
 0x15f   :  { %118 = vsyncpa [#allocation4], 1 }

</bundles_post_ra>
